<compile_context>
chip_gen: v6e
topology: v6e:2x2x1
jax: 0.10.0
libtpu: 0.0.40
codegen_flags: <defaults>
</compile_context>

<pallas_src>
import jax
import jax.numpy as jnp
from jax.experimental import pallas as pl
from jax.experimental.pallas import tpu as pltpu


_LANE = 128
_TARGET_TILE_D = 512                   # ~85% of HBM roofline class tile (measured sweet spot)
_VMEM_TILE_BUDGET = 8 * 1024 * 1024    # in+out x double-buffer; well under v7x 32 MiB scoped VMEM


def _softmax_dim0_kernel(x_ref, o_ref):
    # Per D-tile: exp on the EUP, axis-0 sublane reduce on the XLU, then an EUP reciprocal
    # of the (1, TILE_D) partition row and a cheap VPU multiply (instead of N divides/col).
    # TODO(synk): bf16-native exp path (skip f32 upcast) for bf16 I/O on v6e/v7x; v5e needs f32.
    x = x_ref[...].astype(jnp.float32)
    x_exp = jnp.exp(x)
    partition = jnp.sum(x_exp, axis=0, keepdims=True)      # (1, TILE_D)
    inv = pl.reciprocal(partition, approx=False)           # exact: keeps 1e-6 tolerance
    o_ref[...] = (x_exp * inv).astype(o_ref.dtype)


def _round_up(v, m):
    return ((v + m - 1) // m) * m


def _pick_tile_d(n, d_lanes, itemsize):
    # Keep 2 (in+out) x 2 (double-buffer) x n x TILE_D x itemsize within the budget so the
    # BlockSpec pipeline stays double-buffered even on v7x (64 MiB physical / 32 MiB scoped).
    max_lanes = _VMEM_TILE_BUDGET // (4 * n * itemsize)
    max_lanes = max(_LANE, (max_lanes // _LANE) * _LANE)
    return min(d_lanes, _TARGET_TILE_D, max_lanes)


def softmax_dim0(x):
    """Pallas TPU implementation of: exp(x) / exp(x).sum(0, keepdims=True)."""
    n, d = x.shape
    itemsize = jnp.dtype(x.dtype).itemsize

    # Lane-dense layout: pad D up to a multiple of the tile so every block is a full,
    # unmasked (n, TILE_D) slab (avoids masked vst.msk partial stores). Columns are
    # independent under a dim-0 softmax, so padded columns never affect real ones.
    d_lanes = _round_up(d, _LANE)
    tile_d = _pick_tile_d(n, d_lanes, itemsize)
    d_pad = _round_up(d_lanes, tile_d)
    x_in = jnp.pad(x, ((0, 0), (0, d_pad - d))) if d_pad != d else x

    grid = (d_pad // tile_d,)

    cost = pl.CostEstimate(
        flops=2 * n * d,
        transcendentals=n * d,
        bytes_accessed=2 * n * d * itemsize,
    )

    out = pl.pallas_call(
        _softmax_dim0_kernel,
        out_shape=jax.ShapeDtypeStruct((n, d_pad), x.dtype),
        grid_spec=pltpu.PrefetchScalarGridSpec(
            num_scalar_prefetch=0,
            grid=grid,
            # Dim-0 reduction stays entirely inside each D tile -> no cross-block
            # accumulation; auto-pipelining overlaps DMA of tile j+1 with compute of j.
            in_specs=[pl.BlockSpec((n, tile_d), lambda j: (0, j))],
            out_specs=pl.BlockSpec((n, tile_d), lambda j: (0, j)),
        ),
        compiler_params=pltpu.CompilerParams(
            # D tiles are independent: parallel lets v7x shard them across its 2 TCs;
            # harmless no-op on single-TC v5e/v6e.
            dimension_semantics=("parallel",),
        ),
        cost_estimate=cost,
    )(x_in)

    if d_pad != d:
        out = out[:, :d]
    return out


if __name__ == "__main__":
    key = jax.random.PRNGKey(0)
    k1, k2 = jax.random.split(key)

    def ref_softmax_dim0(v):
        v_exp = jnp.exp(v)
        return v_exp / jnp.sum(v_exp, axis=0, keepdims=True)

    # Shape implied by the module's forward (seq=8, hidden=128): a single full tile.
    x_small = jax.random.normal(k1, (8, 128), dtype=jnp.float32)
    out_small = jax.block_until_ready(softmax_dim0(x_small))
    assert out_small.shape == x_small.shape
    assert out_small.dtype == x_small.dtype
    assert jnp.allclose(out_small, ref_softmax_dim0(x_small), atol=1e-6, rtol=1e-6)

    # Exercise the multi-tile + lane-padding path (D = 640 -> padded to 1024, 2 tiles of 512).
    x_wide = jax.random.normal(k2, (16, 640), dtype=jnp.float32)
    out_wide = jax.block_until_ready(softmax_dim0(x_wide))
    assert out_wide.shape == x_wide.shape
    assert jnp.allclose(out_wide, ref_softmax_dim0(x_wide), atol=1e-6, rtol=1e-6)

    print("KERNEL_OK")
</pallas_src>

<mosaic_0001>
module attributes {stable_mosaic.version = 11 : i64} {
  func.func @_softmax_dim0_kernel(%arg0: i32, %arg1: memref<8x128xf32, #tpu.memory_space<vmem>>, %arg2: memref<8x128xf32, #tpu.memory_space<vmem>>) attributes {dimension_semantics = [#tpu.dimension_semantics<parallel>], iteration_bounds = array<i64: 1>, scalar_prefetch = 0 : i64, scratch_operands = 0 : i64, tpu.core_type = #tpu.core_type<tc>, window_params = [{transform_indices = @transform_0, window_bounds = array<i64: 8, 128>}, {transform_indices = @transform_1, window_bounds = array<i64: 8, 128>}]} {
    %c0 = arith.constant 0 : index
    %c0_0 = arith.constant 0 : index
    %0 = vector.load %arg1[%c0, %c0_0] : memref<8x128xf32, #tpu.memory_space<vmem>>, vector<8x128xf32>
    %1 = math.exp %0 : vector<8x128xf32>
    %cst = arith.constant dense<0.000000e+00> : vector<128xf32>
    %2 = vector.multi_reduction <add>, %1, %cst [0] : vector<8x128xf32> to vector<128xf32>
    %3 = vector.shape_cast %2 : vector<128xf32> to vector<1x128xf32>
    %4 = tpu.reciprocal %3 : vector<1x128xf32> -> vector<1x128xf32>
    %5 = vector.broadcast %4 : vector<1x128xf32> to vector<8x128xf32>
    %6 = arith.mulf %1, %5 : vector<8x128xf32>
    %c0_1 = arith.constant 0 : index
    %c0_2 = arith.constant 0 : index
    %7 = vector.load %arg2[%c0_1, %c0_2] : memref<8x128xf32, #tpu.memory_space<vmem>>, vector<8x128xf32>
    tpu.vector_store %arg2[%c0_1, %c0_2], %6 {strides = array<i32>} : memref<8x128xf32, #tpu.memory_space<vmem>>, vector<8x128xf32>,
    return
  }
  func.func @transform_0(%arg0: i32) -> (i32, i32) {
    %c0_i32 = arith.constant 0 : i32
    %c0_i32_0 = arith.constant 0 : i32
    return %c0_i32, %arg0 : i32, i32
  }
  func.func @transform_1(%arg0: i32) -> (i32, i32) {
    %c0_i32 = arith.constant 0 : i32
    %c0_i32_0 = arith.constant 0 : i32
    return %c0_i32, %arg0 : i32, i32
  }
}

</mosaic_0001>

<bundles_post_ra>
// kernel: tpu_custom_call.1
= control target key start
LH: loop header
LB: loop body
LE: loop exit
PB: predicated region body
PF: predicated region fallthrough
CT: control target
= control target key end

     0   :  { %6 = vsyncpa [#allocation3], 0  ;;  %s116_s0 = inlined_call_operand.hbm [shape: f32[8,128], index: 0, kind: input, shape index: {}]   ;;  %s117_s1 = inlined_call_operand.hbm [shape: f32[8,128], index: 1, kind: output, shape index: {}]  }
   0x1   :  { %7 = vsyncpa [#allocation4], 0  ;;  %s98_s6 = smov [#allocation2]  }
   0x2   :  { %s14_s7 = sshll.u32 %s98_s6, 4  ;;  %s15_s7 = int_to_ptr.vmem [resolvable:$true] %s14_s7 }
   0x3   :  { %s62_s8 = scalar_lea.vmem %s15_s7, 128  ;;  %p67_p1 = scmp.lt.s32.totalorder %s15_s7, %s15_s7 }
   0x4   :  { %p63_p0 = scmp.ne.s32.totalorder %s15_s7, %s62_s8  ;;  %p68_p2 = scmp.lt.s32.totalorder %s62_s8, %s62_s8 }
   0x6   :  { %p69_p3 = por %p68_p2, %p67_p1 }
   0x8   :  { %p70_p4 = pnand %p69_p3, %p63_p0 }
   0xa   :  { %73 = shalt.err (!%p70_p4)
}
   0xb   :  { %17 = dma.hbm_to_vmem [thread:$0]  %s116_s0, 128, %s15_s7, [#allocation3]  }
   0xc   :  { %94 = dma.done.wait [#allocation3], 128  }
   0xd   :  { %95 = vsyncadd [#allocation3], 4294967168  ;;  %v21_v0 = vld [vmem:[#allocation2] sm:$0xff]  ;;  %s99_s11 = smov [#allocation5]  }
   0xe   :  { %v22_v1 = vmul.f32 1.442695, %v21_v0  ;;  %s39_s12 = sshll.u32 %s99_s11, 4  ;;  %s40_s12 = int_to_ptr.vmem [resolvable:$true] %s39_s12 }
   0xf   :  { %s74_s0 = scalar_lea.vmem %s40_s12, 128  ;;  %p79_p6 = scmp.lt.s32.totalorder %s40_s12, %s40_s12 }
  0x10   :  { %50 = vpow2.f32 %v22_v1  ;;  %p75_p5 = scmp.ne.s32.totalorder %s40_s12, %s74_s0  ;;  %p80_p7 = scmp.lt.s32.totalorder %s74_s0, %s74_s0 }
  0x12   :  { %p81_p8 = por %p80_p7, %p79_p6 }
  0x14   :  { %p82_p9 = pnand %p81_p8, %p75_p5 }
  0x1d   :  { %v51_v2 = vpop.eup %50 }
  0x1e   :  { %v24_v3 = vrot.slane %v51_v2, 4 }
  0x20   :  { %v25_v4 = vadd.f32 %v51_v2, %v24_v3 }
  0x22   :  { %v26_v5 = vrot.slane %v25_v4, 2 }
  0x24   :  { %v27_v6 = vadd.f32 %v26_v5, %v25_v4 }
  0x26   :  { %v28_v7 = vrot.slane %v27_v6, 1 }
  0x28   :  { %v29_v8 = vadd.f32 %v28_v7, %v27_v6 }
  0x2a   :  { %52 = vrcp.f32 %v29_v8 }
  0x37   :  { %v53_v9 = vpop.eup %52 }
  0x38   :  { %v31_v10 = vmul.f32 %v53_v9, %v51_v2 }
  0x3a   :  { %32 = vst [vmem:[#allocation5] sm:$0xff] %v31_v10 }
  0x3b   :  { %85 = shalt.err (!%p82_p9)
}
  0x3c   :  { %42 = dma.vmem_to_hbm [thread:$0]  %s40_s12, 128, %s117_s1, [#allocation4]  }
  0x3d   :  { %96 = dma.done.wait [#allocation4], 128  }
  0x3e   :  { %97 = vsyncadd [#allocation4], 4294967168 }
  0x3f   :  { %46 = vsyncpa [#allocation3], 1 }
  0x40   :  { %47 = vsyncpa [#allocation4], 1 }

</bundles_post_ra>
